<compile_context>
chip_gen: v6e
topology: v6e:2x2x1
jax: 0.10.0
libtpu: 0.0.40
codegen_flags: <defaults>
</compile_context>

<pallas_src>
import math

import jax
import jax.numpy as jnp
from jax.experimental import pallas as pl
from jax.experimental.pallas import tpu as pltpu

# ---- module hyper-parameters (small, consistent with the PyTorch module) ----
NUM_AGENTS = 4            # num_agents
CONTEXT_DIM = 16          # context_dim
HIDDEN_DIM = 32           # hidden_dim
NUM_DECAY_COMPONENTS = 3  # num_decay_components
BATCH = 8                 # context batch (the packed slab is specialized to it)

A = NUM_AGENTS
H = HIDDEN_DIM
H2 = HIDDEN_DIM // 2
H4 = HIDDEN_DIM // 4
DP = NUM_DECAY_COMPONENTS + 2     # per-agent decay-net output dim (= 5)
LANES = 128                       # A * HIDDEN_DIM == 128 -> exactly one lane tile
CW_PAD = 8                        # current_weights padded to 8 lanes
TA = BATCH * A                    # 32 lanes = (time step, agent) pairs

assert A * H == LANES
assert 3 * TA + 2 * A <= LANES    # t-folded layer-3 output fits in one lane tile

# ---- packed weight-slab row offsets (all 8-row aligned, zero-padded blocks) ----
R_W1C = 0      # 16 rows: per-agent W1 (context part); agent a -> cols 32a:32a+32
R_W1W = 16     # 8 rows (0:4 real): per-agent W1 (current-weights part)
R_BIAS = 24    # 8 rows: 0=b1, 1=b2, 2=b3 (t-folded layout), 3=ce_b1,
               #         4=folded shift bias (ce_b2@SD1E+sd_b1), 5=sd_b2
R_W2 = 32      # 128 rows: block-diagonal W2 -> output cols 0:64
R_W3 = 160     # 64 rows: block-diagonal W3, t-folded replicated output columns
R_CE1 = 224    # 16 rows: context-encoder W1 -> cols 0:32
R_CES = 240    # 32 rows: folded CE2 @ SD1E -> cols 0:8
R_SD1W = 272   # 8 rows (0:4 real): shift-detector W1 (current-weights part) -> cols 0:8
R_SD2 = 280    # 8 rows: shift-detector W2 -> col 0
R_P = 288      # 8 rows: sigmoid(min|max raw) -> replicated & scaled clip bounds
R_RED = 296    # 32 rows: reduction matrix (per-agent t-mean cols 0:4, grand mean col 4)
SLAB_ROWS = 328

# ---- output-slab column layout (single lane-dense [B,128] output vreg) ----
C_FAST, C_SLOW, C_OSC, C_FINAL = 0, 4, 8, 12
C_MIN, C_MAX, C_PROB = 16, 20, 24


# -----------------------------------------------------------------------------
# Single fused kernel (one grid point): per-agent decay MLPs (block-diagonal),
# lane-packed decay math, context encoder + baseline-shift detector.
# -----------------------------------------------------------------------------
def _decay_learner_kernel(ctx_ref, cw_ref, w_ref, o_ref):
    f32 = jnp.float32
    ctx = ctx_ref[...]                                    # [B, 16]
    cw = cw_ref[...]                                      # [1, 8] (cols 0:A real)

    bias = w_ref[R_BIAS:R_BIAS + 8, :]                    # all six bias rows, one load

    # ---- chain A: all four agent decay MLPs as three lane-dense matmuls ------
    h1 = jnp.maximum(
        jnp.dot(ctx, w_ref[R_W1C:R_W1C + CONTEXT_DIM, :], preferred_element_type=f32)
        + jnp.dot(cw, w_ref[R_W1W:R_W1W + CW_PAD, :], preferred_element_type=f32)
        + bias[0:1, :], 0.0)                              # [B, 128]; Dropout = identity
    h2 = jnp.maximum(
        jnp.dot(h1, w_ref[R_W2:R_W2 + LANES, :], preferred_element_type=f32)
        + bias[1:2, :], 0.0)                              # [B, 128] (cols 64:128 stay 0)
    o3 = (jnp.dot(h2[:, :A * H2], w_ref[R_W3:R_W3 + A * H2, :],
                  preferred_element_type=f32)
          + bias[2:3, :])                                 # [B, 128], t-folded layout:
    #   cols 0:32   = -t * dc0          (fast exp arg, lane = t*A + a)
    #   cols 32:64  = -0.1*t * dc1      (slow exp arg)
    #   cols 64:96  = 2*pi*t * dc2      (oscillation sin arg)
    #   cols 96:104 = raw min|max decay params (4 + 4 lanes)

    # ---- lane-packed decay math: 2-D [B, 32] slabs, no [B,B,A] 3-D arrays ----
    es = jnp.exp(o3[:, 0:2 * TA])                         # one exp on fast|slow slab
    fast = es[:, 0:TA]                                    # [B, 32]
    slow = es[:, TA:2 * TA]
    osc = jnp.sin(o3[:, 2 * TA:3 * TA]) * 0.1             # [B, 32]

    # min/max clip bounds, replicated across the 32 (t, agent) lanes by a tiny
    # matmul against a pack-time replicate-and-scale matrix.
    mm = jnp.dot(jax.nn.sigmoid(o3[:, 3 * TA:3 * TA + 2 * A]),
                 w_ref[R_P:R_P + 8, :], preferred_element_type=f32)     # [B, 128]
    rep_min = mm[:, 0:TA]                                 # 0.1 * sigmoid(min raw)
    rep_max = mm[:, TA:2 * TA] + 0.5                      # 0.5 * sigmoid(max raw) + 0.5

    combined = jnp.clip((fast + slow + osc) * (1.0 / 3.0), rep_min, rep_max)

    # means: shared [32, ·] reduction matrix (cols 0:4 per-agent t-mean, col 4 = 1/32)
    red = w_ref[R_RED:R_RED + TA, :]
    fast_m = jnp.dot(fast, red, preferred_element_type=f32)[:, 0:A]       # [B, A]
    slow_m = jnp.dot(slow, red, preferred_element_type=f32)[:, 0:A]
    osc_m = jnp.dot(osc, red, preferred_element_type=f32)[:, 0:A]
    final_col = jnp.dot(combined, red, preferred_element_type=f32)[:, A:A + 1]  # [B,1]
    min_m = jnp.mean(rep_min[:, 0:A], axis=0, keepdims=True)              # [1, A]
    max_m = jnp.mean(rep_max[:, 0:A], axis=0, keepdims=True)              # [1, A]

    # ---- chain B: context encoder + shift detector (encoder layer 2 folded) --
    cm = jnp.mean(ctx, axis=0, keepdims=True)             # [1, 16]
    e1 = jnp.maximum(
        jnp.dot(cm, w_ref[R_CE1:R_CE1 + CONTEXT_DIM, :], preferred_element_type=f32)
        + bias[3:4, :], 0.0)                              # [1, 128] (cols 0:32 real)
    s1 = jnp.maximum(
        jnp.dot(e1[:, 0:H], w_ref[R_CES:R_CES + H, :], preferred_element_type=f32)
        + jnp.dot(cw, w_ref[R_SD1W:R_SD1W + CW_PAD, :], preferred_element_type=f32)
        + bias[4:5, :], 0.0)                              # [1, 128] (cols 0:8 real)
    logit = (jnp.dot(s1[:, 0:H4], w_ref[R_SD2:R_SD2 + H4, :], preferred_element_type=f32)
             + bias[5:6, :])                              # [1, 128] (col 0 real)
    prob = jax.nn.sigmoid(logit[:, 0:1])                  # [1, 1]

    # ---- direct static-slice stores into the single [B,128] output vreg ------
    o_ref[...] = jnp.zeros_like(o_ref)
    o_ref[:, C_FAST:C_FAST + A] = fast_m
    o_ref[:, C_SLOW:C_SLOW + A] = slow_m
    o_ref[:, C_OSC:C_OSC + A] = osc_m
    o_ref[:, C_FINAL:C_FINAL + 1] = final_col
    o_ref[0:1, C_MIN:C_MIN + A] = min_m
    o_ref[0:1, C_MAX:C_MAX + A] = max_m
    o_ref[0:1, C_PROB:C_PROB + 1] = prob


# -----------------------------------------------------------------------------
# Parameters (synthetic, deterministic) + one-time packing into the weight slab
# -----------------------------------------------------------------------------
def init_params(key):
    ks = jax.random.split(key, 16)

    def w(k, shape, fan_in):
        return jax.random.normal(k, shape, jnp.float32) / math.sqrt(fan_in)

    def bias(k, shape):
        return 0.1 * jax.random.normal(k, shape, jnp.float32)

    return {
        # agent_decay_nets (stacked over agents); first Linear split into
        # context part [16,32] and current-weights part [4,32].
        'ad_w1c': w(ks[0], (A, CONTEXT_DIM, H), CONTEXT_DIM + A),
        'ad_w1w': w(ks[1], (A, A, H), CONTEXT_DIM + A),
        'ad_b1': bias(ks[2], (A, H)),
        'ad_w2': w(ks[3], (A, H, H2), H),
        'ad_b2': bias(ks[4], (A, H2)),
        'ad_w3': w(ks[5], (A, H2, DP), H2),
        'ad_b3': bias(ks[6], (A, DP)),
        # context_encoder
        'ce_w1': w(ks[7], (CONTEXT_DIM, H), CONTEXT_DIM),
        'ce_b1': bias(ks[8], (H,)),
        'ce_w2': w(ks[9], (H, H2), H),
        'ce_b2': bias(ks[10], (H2,)),
        # baseline_shift_detector; first Linear split into encoded / weights parts
        'sd_w1e': w(ks[11], (H2, H4), H2 + A),
        'sd_w1w': w(ks[12], (A, H4), H2 + A),
        'sd_b1': bias(ks[13], (H4,)),
        'sd_w2': w(ks[14], (H4, 1), H4),
        'sd_b2': bias(ks[15], (1,)),
        # TODO(synk): interpolation_net params omitted — its output never reaches
        # any returned tensor in the reference forward (dead code).
    }


def pack_params(p):
    """Pack all weights into one [SLAB_ROWS, 128] f32 slab (once, outside jit).

    The slab is zero-initialized; only the designated blocks are written, so the
    zero-padding the block-diagonal / K-sliced matmuls rely on holds by
    construction.  The slab is specialized to BATCH (time grid t = arange(B)/B
    and the reduction matrices are baked in).
    """
    f32 = jnp.float32
    slab = jnp.zeros((SLAB_ROWS, LANES), f32)

    # agent layer 1: agent a occupies output cols 32a:32a+32
    w1c = jnp.transpose(p['ad_w1c'], (1, 0, 2)).reshape(CONTEXT_DIM, A * H)
    w1w = jnp.transpose(p['ad_w1w'], (1, 0, 2)).reshape(A, A * H)
    slab = slab.at[R_W1C:R_W1C + CONTEXT_DIM, :].set(w1c)
    slab = slab.at[R_W1W:R_W1W + A, :].set(w1w)
    slab = slab.at[R_BIAS + 0, :].set(p['ad_b1'].reshape(A * H))

    # agent layer 2 (block-diagonal) -> output cols 16a:16a+16
    for a in range(A):
        slab = slab.at[R_W2 + H * a:R_W2 + H * (a + 1),
                       H2 * a:H2 * (a + 1)].set(p['ad_w2'][a])
    slab = slab.at[R_BIAS + 1, :A * H2].set(p['ad_b2'].reshape(A * H2))

    # agent layer 3 (block-diagonal, K = 64) with the time grid and the
    # -1 / -0.1 / 2*pi scales folded into replicated output columns.
    b3row = jnp.zeros((LANES,), f32)
    for a in range(A):
        rows = slice(R_W3 + H2 * a, R_W3 + H2 * (a + 1))
        for ti in range(BATCH):
            tv = float(ti) / BATCH
            slab = slab.at[rows, 0 * TA + ti * A + a].set(-tv * p['ad_w3'][a, :, 0])
            slab = slab.at[rows, 1 * TA + ti * A + a].set(-0.1 * tv * p['ad_w3'][a, :, 1])
            slab = slab.at[rows, 2 * TA + ti * A + a].set(
                2.0 * math.pi * tv * p['ad_w3'][a, :, 2])
            b3row = b3row.at[0 * TA + ti * A + a].set(-tv * p['ad_b3'][a, 0])
            b3row = b3row.at[1 * TA + ti * A + a].set(-0.1 * tv * p['ad_b3'][a, 1])
            b3row = b3row.at[2 * TA + ti * A + a].set(
                2.0 * math.pi * tv * p['ad_b3'][a, 2])
        slab = slab.at[rows, 3 * TA + a].set(p['ad_w3'][a, :, 3])          # min raw
        slab = slab.at[rows, 3 * TA + A + a].set(p['ad_w3'][a, :, 4])      # max raw
        b3row = b3row.at[3 * TA + a].set(p['ad_b3'][a, 3])
        b3row = b3row.at[3 * TA + A + a].set(p['ad_b3'][a, 4])
    slab = slab.at[R_BIAS + 2, :].set(b3row)

    # context encoder layer 1
    slab = slab.at[R_CE1:R_CE1 + CONTEXT_DIM, :H].set(p['ce_w1'])
    slab = slab.at[R_BIAS + 3, :H].set(p['ce_b1'])

    # context-encoder layer 2 folded into the shift detector (pack time):
    #   s1_pre = e1 @ (CE2 @ SD1E) + cw @ SD1W + (ce_b2 @ SD1E + sd_b1)
    slab = slab.at[R_CES:R_CES + H, :H4].set(p['ce_w2'] @ p['sd_w1e'])
    slab = slab.at[R_SD1W:R_SD1W + A, :H4].set(p['sd_w1w'])
    slab = slab.at[R_BIAS + 4, :H4].set(p['ce_b2'] @ p['sd_w1e'] + p['sd_b1'])
    slab = slab.at[R_SD2:R_SD2 + H4, 0:1].set(p['sd_w2'])
    slab = slab.at[R_BIAS + 5, 0].set(p['sd_b2'][0])

    # replicate-and-scale matrix for the clip bounds:
    #   rep[:, t*A+a]      = 0.1 * sigmoid(min raw)[a]
    #   rep[:, TA+t*A+a]   = 0.5 * sigmoid(max raw)[a]   (+0.5 added in-kernel)
    for a in range(A):
        for ti in range(BATCH):
            slab = slab.at[R_P + a, ti * A + a].set(0.1)
            slab = slab.at[R_P + A + a, TA + ti * A + a].set(0.5)

    # reduction matrix: cols 0:4 = per-agent mean over the B time steps,
    # col 4 = grand mean over all (t, agent) lanes.
    lane = jnp.arange(TA)
    slab = slab.at[R_RED + lane, lane % A].set(1.0 / BATCH)
    slab = slab.at[R_RED:R_RED + TA, A].set(1.0 / (BATCH * A))
    return slab


# -----------------------------------------------------------------------------
# Forward pass: one pallas_call; wrapper only pads current_weights and slices
# the lane-dense output slab.
# -----------------------------------------------------------------------------
def decay_learner_forward(weight_slab, current_weights, context):
    B = context.shape[0]
    assert B == BATCH and context.shape[1] == CONTEXT_DIM, \
        "weight slab was packed for this batch/context size"
    cw_pad = jnp.zeros((1, CW_PAD), jnp.float32).at[0, :A].set(current_weights)

    out = pl.pallas_call(
        _decay_learner_kernel,
        out_shape=jax.ShapeDtypeStruct((B, LANES), jnp.float32),
        grid=(1,),
        in_specs=[
            pl.BlockSpec((B, CONTEXT_DIM), lambda i: (0, 0)),
            pl.BlockSpec((1, CW_PAD), lambda i: (0, 0)),
            pl.BlockSpec((SLAB_ROWS, LANES), lambda i: (0, 0)),
        ],
        out_specs=pl.BlockSpec((B, LANES), lambda i: (0, 0)),
        compiler_params=pltpu.CompilerParams(dimension_semantics=("arbitrary",)),
        # NOTE: default TPU dot precision (bf16 MXU passes); pass
        # precision=lax.Precision.HIGHEST on the dots if bit-closeness to an
        # f32 reference is required.
        cost_estimate=pl.CostEstimate(flops=450_000, transcendentals=1_024,
                                      bytes_accessed=173_000),
    )(context, cw_pad, weight_slab)

    fast_m = out[:, C_FAST:C_FAST + A]                    # [B, A]
    slow_m = out[:, C_SLOW:C_SLOW + A]                    # [B, A]
    osc_m = out[:, C_OSC:C_OSC + A]                       # [B, A]
    final = out[:, C_FINAL]                               # [B]
    min_m = out[0, C_MIN:C_MIN + A]                       # [A]
    max_m = out[0, C_MAX:C_MAX + A]                       # [A]
    shift_probability = out[0:1, C_PROB]                  # [1]

    # TODO(synk): _update_history mutates decay_history/context_history buffers
    # (stateful side effect, no impact on returned values); not reproduced.
    # TODO(synk): interpolation_net is dead code in the reference forward
    # (its result never reaches the returned dict); intentionally dropped.

    return {
        'decay_rate': final,                               # [B]
        'shift_baseline': shift_probability > 0.5,         # bool [1]
        'shift_probability': shift_probability,            # [1]
        'decay_components': {
            'fast': fast_m,                                # [B, A]
            'slow': slow_m,                                # [B, A]
            'oscillating': osc_m,                          # [B, A]
        },
        'min_decay': min_m,                                # [A]
        'max_decay': max_m,                                # [A]
    }


if __name__ == "__main__":
    key = jax.random.PRNGKey(0)
    k_params, k_w, k_ctx = jax.random.split(key, 3)

    params = init_params(k_params)
    weight_slab = pack_params(params)                      # packed once, outside jit
    current_weights = jax.nn.softmax(
        jax.random.normal(k_w, (NUM_AGENTS,), jnp.float32))          # [num_agents]
    context = jax.random.normal(k_ctx, (BATCH, CONTEXT_DIM), jnp.float32)  # [batch, ctx]

    fwd = jax.jit(decay_learner_forward)
    out = fwd(weight_slab, current_weights, context)
    jax.block_until_ready(out)
    print("KERNEL_OK")
</pallas_src>

<mosaic_0001>
module attributes {stable_mosaic.version = 11 : i64} {
  func.func @_decay_learner_kernel(%arg0: i32, %arg1: memref<8x16xf32, #tpu.memory_space<vmem>>, %arg2: memref<1x8xf32, #tpu.memory_space<vmem>>, %arg3: memref<328x128xf32, #tpu.memory_space<vmem>>, %arg4: memref<8x128xf32, #tpu.memory_space<vmem>>) attributes {dimension_semantics = [#tpu.dimension_semantics<arbitrary>], iteration_bounds = array<i64: 1>, scalar_prefetch = 0 : i64, scratch_operands = 0 : i64, tpu.core_type = #tpu.core_type<tc>, window_params = [{pipeline_mode = #tpu.pipeline_mode<synchronous>, transform_indices = @transform_0, window_bounds = array<i64: 8, 16>}, {pipeline_mode = #tpu.pipeline_mode<synchronous>, transform_indices = @transform_1, window_bounds = array<i64: 1, 8>}, {pipeline_mode = #tpu.pipeline_mode<synchronous>, transform_indices = @transform_2, window_bounds = array<i64: 328, 128>}, {pipeline_mode = #tpu.pipeline_mode<synchronous>, transform_indices = @transform_3, window_bounds = array<i64: 8, 128>}]} {
    %c0 = arith.constant 0 : index
    %c0_0 = arith.constant 0 : index
    %0 = vector.load %arg1[%c0, %c0_0] : memref<8x16xf32, #tpu.memory_space<vmem>>, vector<8x16xf32>
    %c0_1 = arith.constant 0 : index
    %c0_2 = arith.constant 0 : index
    %1 = vector.load %arg2[%c0_1, %c0_2] : memref<1x8xf32, #tpu.memory_space<vmem>>, vector<1x8xf32>
    %c24 = arith.constant 24 : index
    %c0_3 = arith.constant 0 : index
    %2 = vector.load %arg3[%c24, %c0_3] : memref<328x128xf32, #tpu.memory_space<vmem>>, vector<8x128xf32>
    %c0_4 = arith.constant 0 : index
    %c0_5 = arith.constant 0 : index
    %3 = vector.load %arg3[%c0_4, %c0_5] : memref<328x128xf32, #tpu.memory_space<vmem>>, vector<16x128xf32>
    %cst = arith.constant dense<0.000000e+00> : vector<8x128xf32>
    %4 = tpu.matmul %0, %3, %cst {dimension_numbers = #tpu.dot_dimension_numbers<[1], [0], [0], [1], [0, 0, 1, 1], [], []>} : vector<8x16xf32>, vector<16x128xf32>, vector<8x128xf32> -> vector<8x128xf32>
    %c16 = arith.constant 16 : index
    %c0_6 = arith.constant 0 : index
    %5 = vector.load %arg3[%c16, %c0_6] : memref<328x128xf32, #tpu.memory_space<vmem>>, vector<8x128xf32>
    %cst_7 = arith.constant dense<0.000000e+00> : vector<1x128xf32>
    %6 = tpu.matmul %1, %5, %cst_7 {dimension_numbers = #tpu.dot_dimension_numbers<[1], [0], [0], [1], [0, 0, 1, 1], [], []>} : vector<1x8xf32>, vector<8x128xf32>, vector<1x128xf32> -> vector<1x128xf32>
    %7 = vector.broadcast %6 : vector<1x128xf32> to vector<8x128xf32>
    %8 = arith.addf %4, %7 : vector<8x128xf32>
    %9 = vector.extract_strided_slice %2 {offsets = [0, 0], sizes = [1, 128], strides = [1, 1]} : vector<8x128xf32> to vector<1x128xf32>
    %10 = vector.broadcast %9 : vector<1x128xf32> to vector<8x128xf32>
    %11 = arith.addf %8, %10 : vector<8x128xf32>
    %cst_8 = arith.constant 0.000000e+00 : f32
    %12 = vector.broadcast %cst_8 : f32 to vector<8x128xf32>
    %13 = arith.maximumf %11, %12 : vector<8x128xf32>
    %c32 = arith.constant 32 : index
    %c0_9 = arith.constant 0 : index
    %14 = vector.load %arg3[%c32, %c0_9] : memref<328x128xf32, #tpu.memory_space<vmem>>, vector<128x128xf32>
    %cst_10 = arith.constant dense<0.000000e+00> : vector<8x128xf32>
    %15 = tpu.matmul %13, %14, %cst_10 {dimension_numbers = #tpu.dot_dimension_numbers<[1], [0], [0], [1], [0, 0, 1, 1], [], []>} : vector<8x128xf32>, vector<128x128xf32>, vector<8x128xf32> -> vector<8x128xf32>
    %16 = vector.extract_strided_slice %2 {offsets = [1, 0], sizes = [1, 128], strides = [1, 1]} : vector<8x128xf32> to vector<1x128xf32>
    %17 = vector.broadcast %16 : vector<1x128xf32> to vector<8x128xf32>
    %18 = arith.addf %15, %17 : vector<8x128xf32>
    %cst_11 = arith.constant 0.000000e+00 : f32
    %19 = vector.broadcast %cst_11 : f32 to vector<8x128xf32>
    %20 = arith.maximumf %18, %19 : vector<8x128xf32>
    %21 = vector.extract_strided_slice %20 {offsets = [0, 0], sizes = [8, 64], strides = [1, 1]} : vector<8x128xf32> to vector<8x64xf32>
    %c160 = arith.constant 160 : index
    %c0_12 = arith.constant 0 : index
    %22 = vector.load %arg3[%c160, %c0_12] : memref<328x128xf32, #tpu.memory_space<vmem>>, vector<64x128xf32>
    %cst_13 = arith.constant dense<0.000000e+00> : vector<8x128xf32>
    %23 = tpu.matmul %21, %22, %cst_13 {dimension_numbers = #tpu.dot_dimension_numbers<[1], [0], [0], [1], [0, 0, 1, 1], [], []>} : vector<8x64xf32>, vector<64x128xf32>, vector<8x128xf32> -> vector<8x128xf32>
    %24 = vector.extract_strided_slice %2 {offsets = [2, 0], sizes = [1, 128], strides = [1, 1]} : vector<8x128xf32> to vector<1x128xf32>
    %25 = vector.broadcast %24 : vector<1x128xf32> to vector<8x128xf32>
    %26 = arith.addf %23, %25 : vector<8x128xf32>
    %27 = vector.extract_strided_slice %26 {offsets = [0, 0], sizes = [8, 64], strides = [1, 1]} : vector<8x128xf32> to vector<8x64xf32>
    %28 = math.exp %27 : vector<8x64xf32>
    %29 = vector.extract_strided_slice %28 {offsets = [0, 0], sizes = [8, 32], strides = [1, 1]} : vector<8x64xf32> to vector<8x32xf32>
    %30 = vector.extract_strided_slice %28 {offsets = [0, 32], sizes = [8, 32], strides = [1, 1]} : vector<8x64xf32> to vector<8x32xf32>
    %31 = vector.extract_strided_slice %26 {offsets = [0, 64], sizes = [8, 32], strides = [1, 1]} : vector<8x128xf32> to vector<8x32xf32>
    %32 = math.sin %31 : vector<8x32xf32>
    %cst_14 = arith.constant 1.000000e-01 : f32
    %33 = vector.broadcast %cst_14 : f32 to vector<8x32xf32>
    %34 = arith.mulf %32, %33 : vector<8x32xf32>
    %35 = vector.extract_strided_slice %26 {offsets = [0, 96], sizes = [8, 8], strides = [1, 1]} : vector<8x128xf32> to vector<8x8xf32>
    %36 = arith.negf %35 : vector<8x8xf32>
    %37 = math.exp %36 : vector<8x8xf32>
    %cst_15 = arith.constant 1.000000e+00 : f32
    %38 = vector.broadcast %cst_15 : f32 to vector<8x8xf32>
    %39 = arith.addf %38, %37 : vector<8x8xf32>
    %40 = arith.divf %38, %39 : vector<8x8xf32>
    %c288 = arith.constant 288 : index
    %c0_16 = arith.constant 0 : index
    %41 = vector.load %arg3[%c288, %c0_16] : memref<328x128xf32, #tpu.memory_space<vmem>>, vector<8x128xf32>
    %cst_17 = arith.constant dense<0.000000e+00> : vector<8x128xf32>
    %42 = tpu.matmul %40, %41, %cst_17 {dimension_numbers = #tpu.dot_dimension_numbers<[1], [0], [0], [1], [0, 0, 1, 1], [], []>} : vector<8x8xf32>, vector<8x128xf32>, vector<8x128xf32> -> vector<8x128xf32>
    %43 = vector.extract_strided_slice %42 {offsets = [0, 0], sizes = [8, 32], strides = [1, 1]} : vector<8x128xf32> to vector<8x32xf32>
    %44 = vector.extract_strided_slice %42 {offsets = [0, 32], sizes = [8, 32], strides = [1, 1]} : vector<8x128xf32> to vector<8x32xf32>
    %cst_18 = arith.constant 5.000000e-01 : f32
    %45 = vector.broadcast %cst_18 : f32 to vector<8x32xf32>
    %46 = arith.addf %44, %45 : vector<8x32xf32>
    %47 = arith.addf %29, %30 : vector<8x32xf32>
    %48 = arith.addf %47, %34 : vector<8x32xf32>
    %cst_19 = arith.constant 0.333333343 : f32
    %49 = vector.broadcast %cst_19 : f32 to vector<8x32xf32>
    %50 = arith.mulf %48, %49 : vector<8x32xf32>
    %51 = arith.maximumf %43, %50 : vector<8x32xf32>
    %52 = arith.minimumf %46, %51 : vector<8x32xf32>
    %c296 = arith.constant 296 : index
    %c0_20 = arith.constant 0 : index
    %53 = vector.load %arg3[%c296, %c0_20] : memref<328x128xf32, #tpu.memory_space<vmem>>, vector<32x128xf32>
    %cst_21 = arith.constant dense<0.000000e+00> : vector<8x128xf32>
    %54 = tpu.matmul %29, %53, %cst_21 {dimension_numbers = #tpu.dot_dimension_numbers<[1], [0], [0], [1], [0, 0, 1, 1], [], []>} : vector<8x32xf32>, vector<32x128xf32>, vector<8x128xf32> -> vector<8x128xf32>
    %55 = vector.extract_strided_slice %54 {offsets = [0, 0], sizes = [8, 4], strides = [1, 1]} : vector<8x128xf32> to vector<8x4xf32>
    %cst_22 = arith.constant dense<0.000000e+00> : vector<8x128xf32>
    %56 = tpu.matmul %30, %53, %cst_22 {dimension_numbers = #tpu.dot_dimension_numbers<[1], [0], [0], [1], [0, 0, 1, 1], [], []>} : vector<8x32xf32>, vector<32x128xf32>, vector<8x128xf32> -> vector<8x128xf32>
    %57 = vector.extract_strided_slice %56 {offsets = [0, 0], sizes = [8, 4], strides = [1, 1]} : vector<8x128xf32> to vector<8x4xf32>
    %cst_23 = arith.constant dense<0.000000e+00> : vector<8x128xf32>
    %58 = tpu.matmul %34, %53, %cst_23 {dimension_numbers = #tpu.dot_dimension_numbers<[1], [0], [0], [1], [0, 0, 1, 1], [], []>} : vector<8x32xf32>, vector<32x128xf32>, vector<8x128xf32> -> vector<8x128xf32>
    %59 = vector.extract_strided_slice %58 {offsets = [0, 0], sizes = [8, 4], strides = [1, 1]} : vector<8x128xf32> to vector<8x4xf32>
    %cst_24 = arith.constant dense<0.000000e+00> : vector<8x128xf32>
    %60 = tpu.matmul %52, %53, %cst_24 {dimension_numbers = #tpu.dot_dimension_numbers<[1], [0], [0], [1], [0, 0, 1, 1], [], []>} : vector<8x32xf32>, vector<32x128xf32>, vector<8x128xf32> -> vector<8x128xf32>
    %61 = vector.extract_strided_slice %60 {offsets = [0, 4], sizes = [8, 1], strides = [1, 1]} : vector<8x128xf32> to vector<8x1xf32>
    %62 = vector.extract_strided_slice %43 {offsets = [0, 0], sizes = [8, 4], strides = [1, 1]} : vector<8x32xf32> to vector<8x4xf32>
    %cst_25 = arith.constant dense<0.000000e+00> : vector<4xf32>
    %63 = vector.multi_reduction <add>, %62, %cst_25 [0] : vector<8x4xf32> to vector<4xf32>
    %64 = vector.shape_cast %63 : vector<4xf32> to vector<1x4xf32>
    %cst_26 = arith.constant 8.000000e+00 : f32
    %65 = vector.broadcast %cst_26 : f32 to vector<1x4xf32>
    %66 = arith.divf %64, %65 : vector<1x4xf32>
    %67 = vector.extract_strided_slice %46 {offsets = [0, 0], sizes = [8, 4], strides = [1, 1]} : vector<8x32xf32> to vector<8x4xf32>
    %cst_27 = arith.constant dense<0.000000e+00> : vector<4xf32>
    %68 = vector.multi_reduction <add>, %67, %cst_27 [0] : vector<8x4xf32> to vector<4xf32>
    %69 = vector.shape_cast %68 : vector<4xf32> to vector<1x4xf32>
    %cst_28 = arith.constant 8.000000e+00 : f32
    %70 = vector.broadcast %cst_28 : f32 to vector<1x4xf32>
    %71 = arith.divf %69, %70 : vector<1x4xf32>
    %cst_29 = arith.constant dense<0.000000e+00> : vector<16xf32>
    %72 = vector.multi_reduction <add>, %0, %cst_29 [0] : vector<8x16xf32> to vector<16xf32>
    %73 = vector.shape_cast %72 : vector<16xf32> to vector<1x16xf32>
    %cst_30 = arith.constant 8.000000e+00 : f32
    %74 = vector.broadcast %cst_30 : f32 to vector<1x16xf32>
    %75 = arith.divf %73, %74 : vector<1x16xf32>
    %c224 = arith.constant 224 : index
    %c0_31 = arith.constant 0 : index
    %76 = vector.load %arg3[%c224, %c0_31] : memref<328x128xf32, #tpu.memory_space<vmem>>, vector<16x128xf32>
    %cst_32 = arith.constant dense<0.000000e+00> : vector<1x128xf32>
    %77 = tpu.matmul %75, %76, %cst_32 {dimension_numbers = #tpu.dot_dimension_numbers<[1], [0], [0], [1], [0, 0, 1, 1], [], []>} : vector<1x16xf32>, vector<16x128xf32>, vector<1x128xf32> -> vector<1x128xf32>
    %78 = vector.extract_strided_slice %2 {offsets = [3, 0], sizes = [1, 128], strides = [1, 1]} : vector<8x128xf32> to vector<1x128xf32>
    %79 = arith.addf %77, %78 : vector<1x128xf32>
    %cst_33 = arith.constant 0.000000e+00 : f32
    %80 = vector.broadcast %cst_33 : f32 to vector<1x128xf32>
    %81 = arith.maximumf %79, %80 : vector<1x128xf32>
    %82 = vector.extract_strided_slice %81 {offsets = [0, 0], sizes = [1, 32], strides = [1, 1]} : vector<1x128xf32> to vector<1x32xf32>
    %c240 = arith.constant 240 : index
    %c0_34 = arith.constant 0 : index
    %83 = vector.load %arg3[%c240, %c0_34] : memref<328x128xf32, #tpu.memory_space<vmem>>, vector<32x128xf32>
    %cst_35 = arith.constant dense<0.000000e+00> : vector<1x128xf32>
    %84 = tpu.matmul %82, %83, %cst_35 {dimension_numbers = #tpu.dot_dimension_numbers<[1], [0], [0], [1], [0, 0, 1, 1], [], []>} : vector<1x32xf32>, vector<32x128xf32>, vector<1x128xf32> -> vector<1x128xf32>
    %c272 = arith.constant 272 : index
    %c0_36 = arith.constant 0 : index
    %85 = vector.load %arg3[%c272, %c0_36] : memref<328x128xf32, #tpu.memory_space<vmem>>, vector<8x128xf32>
    %cst_37 = arith.constant dense<0.000000e+00> : vector<1x128xf32>
    %86 = tpu.matmul %1, %85, %cst_37 {dimension_numbers = #tpu.dot_dimension_numbers<[1], [0], [0], [1], [0, 0, 1, 1], [], []>} : vector<1x8xf32>, vector<8x128xf32>, vector<1x128xf32> -> vector<1x128xf32>
    %87 = arith.addf %84, %86 : vector<1x128xf32>
    %88 = vector.extract_strided_slice %2 {offsets = [4, 0], sizes = [1, 128], strides = [1, 1]} : vector<8x128xf32> to vector<1x128xf32>
    %89 = arith.addf %87, %88 : vector<1x128xf32>
    %cst_38 = arith.constant 0.000000e+00 : f32
    %90 = vector.broadcast %cst_38 : f32 to vector<1x128xf32>
    %91 = arith.maximumf %89, %90 : vector<1x128xf32>
    %92 = vector.extract_strided_slice %91 {offsets = [0, 0], sizes = [1, 8], strides = [1, 1]} : vector<1x128xf32> to vector<1x8xf32>
    %c280 = arith.constant 280 : index
    %c0_39 = arith.constant 0 : index
    %93 = vector.load %arg3[%c280, %c0_39] : memref<328x128xf32, #tpu.memory_space<vmem>>, vector<8x128xf32>
    %cst_40 = arith.constant dense<0.000000e+00> : vector<1x128xf32>
    %94 = tpu.matmul %92, %93, %cst_40 {dimension_numbers = #tpu.dot_dimension_numbers<[1], [0], [0], [1], [0, 0, 1, 1], [], []>} : vector<1x8xf32>, vector<8x128xf32>, vector<1x128xf32> -> vector<1x128xf32>
    %95 = vector.extract_strided_slice %2 {offsets = [5, 0], sizes = [1, 128], strides = [1, 1]} : vector<8x128xf32> to vector<1x128xf32>
    %96 = arith.addf %94, %95 : vector<1x128xf32>
    %97 = vector.extract_strided_slice %96 {offsets = [0, 0], sizes = [1, 1], strides = [1, 1]} : vector<1x128xf32> to vector<1x1xf32>
    %98 = arith.negf %97 : vector<1x1xf32>
    %99 = math.exp %98 : vector<1x1xf32>
    %cst_41 = arith.constant 1.000000e+00 : f32
    %100 = vector.broadcast %cst_41 : f32 to vector<1x1xf32>
    %101 = arith.addf %100, %99 : vector<1x1xf32>
    %102 = arith.divf %100, %101 : vector<1x1xf32>
    %cst_42 = arith.constant 0.000000e+00 : f32
    %103 = vector.broadcast %cst_42 : f32 to vector<8x128xf32>
    %c0_43 = arith.constant 0 : index
    %c0_44 = arith.constant 0 : index
    %104 = vector.load %arg4[%c0_43, %c0_44] : memref<8x128xf32, #tpu.memory_space<vmem>>, vector<8x128xf32>
    tpu.vector_store %arg4[%c0_43, %c0_44], %103 {strides = array<i32>} : memref<8x128xf32, #tpu.memory_space<vmem>>, vector<8x128xf32>,
    %c0_45 = arith.constant 0 : index
    %c0_46 = arith.constant 0 : index
    %105 = vector.load %arg4[%c0_45, %c0_46] : memref<8x128xf32, #tpu.memory_space<vmem>>, vector<8x4xf32>
    tpu.vector_store %arg4[%c0_45, %c0_46], %55 {strides = array<i32>} : memref<8x128xf32, #tpu.memory_space<vmem>>, vector<8x4xf32>,
    %c0_47 = arith.constant 0 : index
    %c4 = arith.constant 4 : index
    %106 = vector.load %arg4[%c0_47, %c4] : memref<8x128xf32, #tpu.memory_space<vmem>>, vector<8x4xf32>
    tpu.vector_store %arg4[%c0_47, %c4], %57 {strides = array<i32>} : memref<8x128xf32, #tpu.memory_space<vmem>>, vector<8x4xf32>,
    %c0_48 = arith.constant 0 : index
    %c8 = arith.constant 8 : index
    %107 = vector.load %arg4[%c0_48, %c8] : memref<8x128xf32, #tpu.memory_space<vmem>>, vector<8x4xf32>
    tpu.vector_store %arg4[%c0_48, %c8], %59 {strides = array<i32>} : memref<8x128xf32, #tpu.memory_space<vmem>>, vector<8x4xf32>,
    %c0_49 = arith.constant 0 : index
    %c12 = arith.constant 12 : index
    %108 = vector.load %arg4[%c0_49, %c12] : memref<8x128xf32, #tpu.memory_space<vmem>>, vector<8x1xf32>
    tpu.vector_store %arg4[%c0_49, %c12], %61 {strides = array<i32>} : memref<8x128xf32, #tpu.memory_space<vmem>>, vector<8x1xf32>,
    %c0_50 = arith.constant 0 : index
    %c16_51 = arith.constant 16 : index
    %109 = vector.load %arg4[%c0_50, %c16_51] : memref<8x128xf32, #tpu.memory_space<vmem>>, vector<1x4xf32>
    tpu.vector_store %arg4[%c0_50, %c16_51], %66 {strides = array<i32>} : memref<8x128xf32, #tpu.memory_space<vmem>>, vector<1x4xf32>,
    %c0_52 = arith.constant 0 : index
    %c20 = arith.constant 20 : index
    %110 = vector.load %arg4[%c0_52, %c20] : memref<8x128xf32, #tpu.memory_space<vmem>>, vector<1x4xf32>
    tpu.vector_store %arg4[%c0_52, %c20], %71 {strides = array<i32>} : memref<8x128xf32, #tpu.memory_space<vmem>>, vector<1x4xf32>,
    %c0_53 = arith.constant 0 : index
    %c24_54 = arith.constant 24 : index
    %111 = vector.load %arg4[%c0_53, %c24_54] : memref<8x128xf32, #tpu.memory_space<vmem>>, vector<1x1xf32>
    tpu.vector_store %arg4[%c0_53, %c24_54], %102 {strides = array<i32>} : memref<8x128xf32, #tpu.memory_space<vmem>>, vector<1x1xf32>,
    return
  }
  func.func @transform_0(%arg0: i32) -> (i32, i32) {
    %c0_i32 = arith.constant 0 : i32
    %c0_i32_0 = arith.constant 0 : i32
    %c0_i32_1 = arith.constant 0 : i32
    return %c0_i32, %c0_i32_0 : i32, i32
  }
  func.func @transform_1(%arg0: i32) -> (i32, i32) {
    %c0_i32 = arith.constant 0 : i32
    %c0_i32_0 = arith.constant 0 : i32
    %c0_i32_1 = arith.constant 0 : i32
    return %c0_i32, %c0_i32_0 : i32, i32
  }
  func.func @transform_2(%arg0: i32) -> (i32, i32) {
    %c0_i32 = arith.constant 0 : i32
    %c0_i32_0 = arith.constant 0 : i32
    %c0_i32_1 = arith.constant 0 : i32
    return %c0_i32, %c0_i32_0 : i32, i32
  }
  func.func @transform_3(%arg0: i32) -> (i32, i32) {
    %c0_i32 = arith.constant 0 : i32
    %c0_i32_0 = arith.constant 0 : i32
    %c0_i32_1 = arith.constant 0 : i32
    return %c0_i32, %c0_i32_0 : i32, i32
  }
}

</mosaic_0001>

<bundles_post_ra>
// kernel: decay_learner_forward.1
= control target key start
LH: loop header
LB: loop body
LE: loop exit
PB: predicated region body
PF: predicated region fallthrough
CT: control target
= control target key end

     0   :  { %8 = vsyncpa [#allocation3], 0  ;;  %s1539_s12 = smov [#allocation2]   ;;  %s1779_s0 = inlined_call_operand.vmem [shape: f32[8,16], index: 0, kind: input, shape index: {}]   ;;  %s1780_s1 = inlined_call_operand.vmem [shape: f32[1,8], index: 1, kind: input, shape index: {}]   ;;  %s1781_s2 = inlined_call_operand.hbm [shape: f32[328,128], index: 2, kind: input, shape index: {}]   ;;  %s1782_s3 = inlined_call_operand.vmem [shape: f32[8,128], index: 3, kind: output, shape index: {}]  }
   0x1   :  { %s18_s13 = sshll.u32 %s1539_s12, 4  ;;  %s19_s13 = int_to_ptr.vmem [resolvable:$true] %s18_s13 }
   0x2   :  { %s1525_s14 = scalar_lea.vmem %s19_s13, 5248  ;;  %p1530_p1 = scmp.lt.s32.totalorder %s19_s13, %s19_s13 }
   0x3   :  { %p1526_p0 = scmp.ne.s32.totalorder %s19_s13, %s1525_s14  ;;  %p1531_p2 = scmp.lt.s32.totalorder %s1525_s14, %s1525_s14 }
   0x5   :  { %p1532_p3 = por %p1531_p2, %p1530_p1 }
   0x7   :  { %p1533_p4 = pnand %p1532_p3, %p1526_p0 }
   0x9   :  { %1536 = shalt.err (!%p1533_p4)
}
   0xa   :  { %s1540_s15 = smov 128   ;;  %s1541_s16 = smov 8  }
   0xb   :  { %24 = dma.hbm_to_vmem [thread:$0]  %s1781_s2, 5248, %s19_s13, [#allocation3], %s1540_s15, %s1540_s15, %s1541_s16  }
   0xc   :  { %1537 = dma.done.wait [#allocation3], 5248  }
   0xd   :  { %1538 = vsyncadd [#allocation3], 4294962048  ;;  %v1542_v0 = vmov 0.0   ;;  %vm1543_vm0 = vmmov 0   ;;  %vm34_vm1 = vcmask 64512   ;;  %v33_v1 = vld [vmem:[#allocation2 + $0x10] sm:$0xff]  ;;  %v108_v27 = vlaneseq }
   0xe   :  { %1338 = vmatprep.subr.mxu0 %v1542_v0  ;;  %1212 = vst [vmem:[%s1782_s3] sm:$0xff] %v1542_v0  ;;  %1343 = vmatprep.subr.mxu1 %v1542_v0  ;;  %v32_v2 = vld [vmem:[#allocation2 + $0x8] sm:$0xff]  ;;  %v1594_v3 = vld [vmem:[%s1780_s1] sm:$0x1]  ;;  %vm112_vm2 = vcmask 130048   ;;  %v207_v6 = vld [vmem:[#allocation2 + $0x98] sm:$0xff]  ;;  %vm295_vm3 = vcmask 523264  }
   0xf   :  { %1340 = vmatprep.mubr.msk.f32.mxu0 %vm1543_vm0, %v1542_v0  ;;  %1347 = vmatprep.mubr.msk.f32.mxu1 %vm1543_vm0, %v1542_v0  ;;  %v31_v4 = vld [vmem:[#allocation2] sm:$0xff]  ;;  %v206_v7 = vld [vmem:[#allocation2 + $0x90] sm:$0xff]  ;;  %v205_v8 = vld [vmem:[#allocation2 + $0x88] sm:$0xff]  ;;  %v109_v28 = vshrl.u32 %v108_v27, 7  ;;  %s1551_s1 = smov 32   ;;  %s1552_s24 = smov 64  }
  0x10   :  { %1339 = vmatpush3.msra.mxu0 %v33_v1  ;;  %1344 = vmatpush3.msra.mxu1 %v32_v2  ;;  %v1599_v5 = vld [vmem:[%s1779_s0] sm:$0xff]  ;;  %v203_v10 = vld [vmem:[#allocation2 + $0x78] sm:$0xff]  ;;  %v202_v11 = vld [vmem:[#allocation2 + $0x70] sm:$0xff]  ;;  %s1550_s0 = smov 96   ;;  %s1553_s27 = smov 4  }
  0x11   :  { %1341 = vmatmul.mubr.msk.f32.vlgmr.msra.gmra.mxu0 %vm34_vm1, %v1594_v3  ;;  %1345 = vmatprep.subr.mxu1 %v1542_v0  ;;  %v204_v9 = vld [vmem:[#allocation2 + $0x80] sm:$0xff]  ;;  %v201_v12 = vld [vmem:[#allocation2 + $0x68] sm:$0xff]  ;;  %v199_v14 = vld [vmem:[#allocation2 + $0x58] sm:$0xff]  ;;  %v110_v29 = vsub.s32 0, %v109_v28  ;;  %v210_v43 = vsub.s32 1, %v109_v28  ;;  %v293_v49 = vsub.s32 2, %v109_v28 }
  0x12   :  { %1346 = vmatpush3.msra.mxu1 %v31_v4  ;;  %1350 = vmatprep.subr.mxu0 %v1542_v0  ;;  %v200_v13 = vld [vmem:[#allocation2 + $0x60] sm:$0xff]  ;;  %v198_v15 = vld [vmem:[#allocation2 + $0x50] sm:$0xff]  ;;  %v197_v16 = vld [vmem:[#allocation2 + $0x48] sm:$0xff]  ;;  %s1554_s28 = smov 16   ;;  %s1555_s6 = smov 116  }
  0x13   :  { %1348 = vmatmul.mubr.msk.f32.vlgmr.msra.gmra.mxu1 %vm112_vm2, %v1599_v5  ;;  %1351 = vmatpush3.msra.mxu0 %v207_v6  ;;  %v196_v17 = vld [vmem:[#allocation2 + $0x40] sm:$0xff]  ;;  %v195_v18 = vld [vmem:[#allocation2 + $0x38] sm:$0xff]  ;;  %v194_v19 = vld [vmem:[#allocation2 + $0x30] sm:$0xff]  ;;  %s1556_s13 = smov 24  }
  0x14   :  { %1352 = vmatprep.subr.mxu0 %v1542_v0  ;;  %1382 = vmatprep.mubr.msk.f32.mxu0 %vm1543_vm0, %v1542_v0  ;;  %v193_v20 = vld [vmem:[#allocation2 + $0x28] sm:$0xff]  ;;  %v192_v21 = vld [vmem:[#allocation2 + $0x20] sm:$0xff]  ;;  %v290_v22 = vld [vmem:[#allocation2 + $0xd8] sm:$0xff] }
  0x15   :  { %1353 = vmatpush3.msra.mxu0 %v206_v7  ;;  %1385 = vmatprep.subr.mxu1 %v1542_v0  ;;  %v289_v23 = vld [vmem:[#allocation2 + $0xd0] sm:$0xff]  ;;  %v288_v24 = vld [vmem:[#allocation2 + $0xc8] sm:$0xff]  ;;  %v287_v25 = vld [vmem:[#allocation2 + $0xc0] sm:$0xff]  ;;  %v1544_v7 = vmov 683565275  }
  0x16   :  { %1354 = vmatprep.subr.mxu0 %v1542_v0  ;;  %1401 = vmatprep.mubr.msk.f32.mxu1 %vm1543_vm0, %v1542_v0  ;;  %v286_v26 = vld [vmem:[#allocation2 + $0xb8] sm:$0xff]  ;;  %v285_v40 = vld [vmem:[#allocation2 + $0xb0] sm:$0xff]  ;;  %v284_v41 = vld [vmem:[#allocation2 + $0xa8] sm:$0xff] }
  0x17   :  { %1355 = vmatpush3.msra.mxu0 %v205_v8  ;;  %1386 = vmatpush3.msra.mxu1 %v290_v22  ;;  %v1633_v30 = vld [vmem:[#allocation2 + $0x18] sm:$0xff]  ;;  %v283_v42 = vld [vmem:[#allocation2 + $0xa0] sm:$0xff]  ;;  %v1549_v22 = vmov 1326507024  }
  0x18   :  { %1356 = vmatprep.subr.mxu0 %v1542_v0  ;;  %1387 = vmatprep.subr.mxu1 %v1542_v0  ;;  %v189_v33 = vrot.slane %v1633_v30, %v110_v29  ;;  %v211_v44 = vrot.slane %v1633_v30, %v210_v43  ;;  %v294_v50 = vrot.slane %v1633_v30, %v293_v49  ;;  %v482_v58 = vld [vmem:[#allocation2 + $0x120] sm:$0xff] }
  0x19   :  { %1357 = vmatpush3.msra.mxu0 %v204_v9  ;;  %1388 = vmatpush3.msra.mxu1 %v289_v23  ;;  %v1545_v9 = vmov 2475754826  }
  0x1a   :  { %1358 = vmatprep.subr.mxu0 %v1542_v0  ;;  %1389 = vmatprep.subr.mxu1 %v1542_v0 }
  0x1b   :  { %1359 = vmatpush3.msra.mxu0 %v203_v10  ;;  %1390 = vmatpush3.msra.mxu1 %v288_v24 }
  0x1c   :  { %1360 = vmatprep.subr.mxu0 %v1542_v0  ;;  %1391 = vmatprep.subr.mxu1 %v1542_v0 }
  0x1d   :  { %1361 = vmatpush3.msra.mxu0 %v202_v11  ;;  %1392 = vmatpush3.msra.mxu1 %v287_v25 }
  0x1e   :  { %1362 = vmatprep.subr.mxu0 %v1542_v0  ;;  %1393 = vmatprep.subr.mxu1 %v1542_v0 }
  0x1f   :  { %1363 = vmatpush3.msra.mxu0 %v201_v12  ;;  %1394 = vmatpush3.msra.mxu1 %v286_v26  ;;  %v1546_v12 = vmov 2131351028  }
  0x20   :  { %1364 = vmatprep.subr.mxu0 %v1542_v0  ;;  %1395 = vmatprep.subr.mxu1 %v1542_v0 }
  0x21   :  { %1365 = vmatpush3.msra.mxu0 %v200_v13  ;;  %1396 = vmatpush3.msra.mxu1 %v285_v40 }
  0x22   :  { %1366 = vmatprep.subr.mxu0 %v1542_v0  ;;  %1397 = vmatprep.subr.mxu1 %v1542_v0 }
  0x23   :  { %1367 = vmatpush3.msra.mxu0 %v199_v14  ;;  %1398 = vmatpush3.msra.mxu1 %v284_v41  ;;  %v1660_v41 = vld [vmem:[#allocation2 + $0x140] sm:$0xff] }
  0x24   :  { %1368 = vmatprep.subr.mxu0 %v1542_v0  ;;  %1399 = vmatprep.subr.mxu1 %v1542_v0 }
  0x25   :  { %1369 = vmatpush3.msra.mxu0 %v198_v15  ;;  %1400 = vmatpush3.msra.mxu1 %v283_v42  ;;  %v1547_v15 = vmov 2102212464  }
  0x26   :  { %1370 = vmatprep.subr.mxu0 %v1542_v0  ;;  %1404 = vmatprep.subr.mxu1 %v1542_v0 }
  0x27   :  { %1371 = vmatpush3.msra.mxu0 %v197_v16 }
  0x28   :  { %1372 = vmatprep.subr.mxu0 %v1542_v0 }
  0x29   :  { %1373 = vmatpush3.msra.mxu0 %v196_v17 }
  0x2a   :  { %1374 = vmatprep.subr.mxu0 %v1542_v0 }
  0x2b   :  { %1375 = vmatpush3.msra.mxu0 %v195_v18 }
  0x2c   :  { %1376 = vmatprep.subr.mxu0 %v1542_v0 }
  0x2d   :  { %1377 = vmatpush3.msra.mxu0 %v194_v19  ;;  %v1548_v19 = vmov 920167782  }
  0x2e   :  { %1378 = vmatprep.subr.mxu0 %v1542_v0 }
  0x2f   :  { %1379 = vmatpush3.msra.mxu0 %v193_v20 }
  0x30   :  { %1380 = vmatprep.subr.mxu0 %v1542_v0 }
  0x31   :  { %1381 = vmatpush3.msra.mxu0 %v192_v21 }
  0x32   :  { %1431 = vmatprep.subr.mxu0 %v1542_v0 }
  0xd1   :  { %v104_v31 = vpop.f32.mrf.mxu0 }
  0xd2   :  { %v111_v32 = vrot.slane %v104_v31, %v110_v29 }
  0xd3   :  { %v1342_v34 = vpop.f32.mrf.mxu0  ;;  %v182_v35 = vpop.f32.mrf.mxu1 }
  0xd4   :  { %v183_v36 = vadd.f32 %v182_v35, %v111_v32 }
  0xd5   :  { %v1349_v37 = vpop.f32.mrf.mxu1 }
  0xd6   :  { %v190_v38 = vadd.f32 %v189_v33, %v183_v36 }
  0xd8   :  { %v191_v39 = vmax.f32 %v190_v38, 0.0 }
  0xda   :  { %1383 = vmatmul.mubr.f32.vlgmr.msra.gmra.mxu0 %v191_v39 }
  0xdb   :  { %1439 = vmatprep.mubr.msk.f32.mxu0 %vm1543_vm0, %v1542_v0  ;;  %1432 = vmatpush3.msra.mxu0 %v1660_v41 }
  0xdc   :  { %1433 = vmatprep.subr.mxu0 %v1542_v0 }
 0x19a   :  { %v278_v45 = vpop.f32.mrf.mxu0 }
 0x19b   :  { %v279_v46 = vadd.f32 %v278_v45, %v211_v44 }
 0x19c   :  { %v1384_v47 = vpop.f32.mrf.mxu0 }
 0x19d   :  { %v282_v48 = vmax.f32 %v279_v46, 0.0 }
 0x19f   :  { %1402 = vmatmul.mubr.msk.f32.vlgmr.msra.gmra.mxu1 %vm295_vm3, %v282_v48 }
 0x1a0   :  { %1406 = vmatprep.mubr.msk.f32.mxu1 %vm1543_vm0, %v1542_v0  ;;  %1405 = vmatpush3.msra.mxu1 %v482_v58 }
 0x1a1   :  { %1409 = vmatprep.subr.mxu1 %v1542_v0 }
 0x25f   :  { %v365_v51 = vpop.f32.mrf.mxu1 }
 0x260   :  { %v1645_v52 = vadd.f32 %v365_v51, %v294_v50  ;;  %v1670_v50 = vld [vmem:[#allocation2 + $0x138] sm:$0xff] }
 0x261   :  { %v1403_v53 = vpop.f32.mrf.mxu1  ;;  %1434 = vmatpush3.msra.mxu0 %v1670_v50 }
 0x262   :  { %v369_v54 = vmul.f32 1.442695, %v1645_v52  ;;  %v374_v55 = vand.u32 2139095040, %v1645_v52  ;;  %v1262_v56 = vmul.f32 -1.442695, %v1645_v52  ;;  %v1674_v53 = vld [vmem:[#allocation2 + $0x130] sm:$0xff]  ;;  %1435 = vmatprep.subr.mxu0 %v1542_v0  ;;  %vm463_vm3 = vweird.f32 %v1645_v52 }
 0x263   :  { %v371_v60 = vand.u32 2147483647, %v1645_v52  ;;  %1436 = vmatpush3.msra.mxu0 %v1674_v53  ;;  %vm373_vm11 = vcmp.lt.s32.totalorder %v1645_v52, 0 }
 0x264   :  { %1503 = vpow2.f32 %v369_v54  ;;  %v375_v57 = vshrl.u32 %v374_v55, 23  ;;  %v1680_v55 = vld [vmem:[#allocation2 + $0x128] sm:$0xff]  ;;  %1437 = vmatprep.subr.mxu0 %v1542_v0 }
 0x265   :  { %1505 = vpow2.f32 %v1262_v56  ;;  %v378_v63 = vand.u32 8388607, %v371_v60  ;;  %1438 = vmatpush3.msra.mxu0 %v1680_v55  ;;  %vm372_vm12 = vcmp.le.f32.partialorder %v371_v60, 0.7853982 }
 0x266   :  { %v1258_v59 = vadd.s32 4294967169, %v375_v57  ;;  %1453 = vmatprep.subr.mxu0 %v1542_v0 }
 0x267   :  { %v379_v6 = vor.u32 8388608, %v378_v63 }
 0x268   :  { %v381_v61 = vadd.s32 1, %v1258_v59 }
 0x269   :  { %v419_v40 = vshll.u32 %v379_v6, 8 }
 0x26a   :  { %vm382_vm4 = vcmp.gt.s32.totalorder %v381_v61, 0 }
 0x26b   :  { %v383_v62 = vsel %vm382_vm4, %v381_v61, 0  ;;  %vm580_vm4 = vcmask 261120  }
 0x26c   :  { %v385_v1 = vand.u32 31, %v383_v62  ;;  %v384_v2 = vshrl.u32 %v383_v62, 5 }
 0x26e   :  { %v386_v4 = vsub.s32 32, %v385_v1  ;;  %v388_v8 = vshll.u32 %v1544_v7, %v385_v1  ;;  %v391_v10 = vshll.u32 %v1545_v9, %v385_v1  ;;  %v394_v14 = vshll.u32 %v1546_v12, %v385_v1 }
 0x26f   :  { %v397_v18 = vshll.u32 %v1547_v15, %v385_v1  ;;  %v400_v21 = vshll.u32 %v1548_v19, %v385_v1  ;;  %vm403_vm5 = vcmp.lt.s32.totalorder %v384_v2, 1  ;;  %vm406_vm6 = vcmp.lt.s32.totalorder %v384_v2, 4 }
 0x270   :  { %v389_v11 = vshrl.u32 %v1545_v9, %v386_v4  ;;  %v392_v13 = vshrl.u32 %v1546_v12, %v386_v4  ;;  %v395_v16 = vshrl.u32 %v1547_v15, %v386_v4  ;;  %v398_v20 = vshrl.u32 %v1548_v19, %v386_v4 }
 0x271   :  { %v1654_v17 = vpop.eup %1503  ;;  %v401_v23 = vshrl.u32 %v1549_v22, %v386_v4  ;;  %v387_v32 = vshrl.u32 %v1544_v7, %v386_v4  ;;  %vm405_vm7 = vcmp.lt.s32.totalorder %v384_v2, 3  ;;  %vm404_vm8 = vcmp.lt.s32.totalorder %v384_v2, 2 }
 0x272   :  { %v1506_v24 = vpop.eup %1505  ;;  %560 = vrot.lane.b32.xlu1 %v1654_v17, %s1550_s0  ;;  %v390_v25 = vor.u32 %v389_v11, %v388_v8  ;;  %v393_v26 = vor.u32 %v392_v13, %v391_v10  ;;  %v396_v27 = vor.u32 %v395_v16, %v394_v14  ;;  %v399_v29 = vor.u32 %v398_v20, %v397_v18 }
 0x273   :  { %v479_v28 = vadd.f32 1.0, %v1506_v24  ;;  %v402_v31 = vor.u32 %v401_v23, %v400_v21 }
 0x274   :  { %v408_v33 = vsel %vm406_vm6, %v396_v27, 2102212464  ;;  %v411_v34 = vsel %vm403_vm5, %v390_v25, %v393_v26  ;;  %v415_v35 = vsel %vm403_vm5, %v393_v26, %v396_v27  ;;  %v412_v36 = vsel %vm406_vm6, %v399_v29, 920167782 }
 0x275   :  { %1507 = vrcp.f32 %v479_v28  ;;  %v416_v37 = vsel %vm406_vm6, %v402_v31, 1326507024  ;;  %v413_v38 = vsel %vm405_vm7, %v396_v27, %v412_v36  ;;  %v407_v42 = vsel %vm403_vm5, %v387_v32, %v390_v25 }
 0x276   :  { %v417_v39 = vsel %vm405_vm7, %v399_v29, %v416_v37  ;;  %v409_v43 = vsel %vm405_vm7, %v393_v26, %v408_v33  ;;  %v414_v44 = vsel %vm404_vm8, %v411_v34, %v413_v38  ;;  %vm872_vm5 = vcmask 31744  }
 0x277   :  { %v418_v45 = vsel %vm404_vm8, %v415_v35, %v417_v39  ;;  %v1667_v48 = vmul.u32.u64.low %v419_v40, %v414_v44  ;;  %v1668_v49 = vmul.u32.u64.high %v419_v40, %v414_v44, %v1667_v48  ;;  %v410_v51 = vsel %vm404_vm8, %v407_v42, %v409_v43 }
 0x278   :  { %v1664_v46 = vmul.u32.u64.low %v419_v40, %v418_v45  ;;  %v1665_v47 = vmul.u32.u64.high %v419_v40, %v418_v45, %v1664_v46  ;;  %v426_v56 = vmul.u32 %v419_v40, %v410_v51  ;;  %vm1224_vm6 = vcmask 97344  }
 0x279   :  { %v429_v54 = vadd.s32 1, %v1668_v49  ;;  %vm1230_vm7 = vcmask 105568   ;;  %vm1236_vm8 = vcmask 155776  }
 0x27a   :  { %vm428_vm9 = vc.u32 %v1665_v47, %v1667_v48  ;;  %v427_v9 = vadd.s32 %v1667_v48, %v1665_v47 }
 0x27b   :  { %v430_v57 = vsel %vm428_vm9, %v429_v54, %v1668_v49  ;;  %v900_v49 = vld [vmem:[#allocation2 + $0xe8] sm:$0xff]  ;;  %vm1242_vm9 = vcmask 188576  }
 0x27c   :  { %v431_v58 = vadd.s32 %v430_v57, %v426_v56 }
 0x27e   :  { %v432_v59 = vadd.s32 536870912, %v431_v58 }
 0x280   :  { %v433_v62 = vshrl.u32 %v432_v59, 30 }
 0x282   :  { %v1508_v61 = vpop.eup %1507  ;;  %v434_v63 = vshll.u32 %v433_v62, 30  ;;  %v457_v23 = vsub.s32 4, %v433_v62 }
 0x283   :  { %484 = vrot.lane.b32.xlu0 %v1508_v61, %s1551_s1 }
 0x284   :  { %v435_v1 = vsub.s32 %v431_v58, %v434_v63  ;;  %v458_v26 = vsel %vm373_vm11, %v457_v23, %v433_v62 }
 0x285   :  { %v460_v27 = vsel %vm372_vm12, 0, %v458_v26 }
 0x286   :  { %v437_v2 = vsub.s32 0, %v435_v1  ;;  %v464_v28 = vadd.s32 3, %v460_v27 }
 0x288   :  { %v1259_v4 = vmin.u32 %v437_v2, %v435_v1  ;;  %v465_v29 = vand.u32 3, %v464_v28  ;;  %v1130_v28 = vld [vmem:[#allocation2 + $0x118] sm:$0xff] }
 0x28a   :  { %v439_v6 = vclz %v1259_v4  ;;  %vm470_vm13 = vcmp.eq.s32.totalorder %v465_v29, 2  ;;  %vm467_vm14 = vcmp.eq.s32.totalorder %v465_v29, 0  ;;  %vm466_vm15 = vcmp.lt.s32.totalorder %v465_v29, 2 }
 0x28c   :  { %v1260_v7 = vadd.s32 4294967294, %v439_v6 }
 0x28e   :  { %vm1261_vm10 = vcmp.lt.s32.totalorder %v1260_v7, 0 }
 0x28f   :  { %v442_v8 = vsel %vm1261_vm10, 0, %v1260_v7 }
 0x290   :  { %v443_v10 = vsub.s32 32, %v442_v8  ;;  %v447_v11 = vsub.s32 4294967266, %v442_v8  ;;  %v444_v12 = vshll.u32 %v435_v1, %v442_v8  ;;  %v982_v8 = vld [vmem:[#allocation2 + $0x110] sm:$0xff] }
 0x292   :  { %v445_v13 = vshrl.u32 %v427_v9, %v443_v10  ;;  %v448_v14 = vadd.s32 127, %v447_v11 }
 0x294   :  { %v446_v15 = vor.u32 %v445_v13, %v444_v12  ;;  %v449_v16 = vshll.u32 %v448_v14, 23 }
 0x296   :  { %v450_v18 = vor.u32 4788187, %v449_v16  ;;  %v453_v20 = vcvt.s32.f32 %v446_v15  ;;  %v902_v16 = vrot.slane %v1633_v30, 3 }
 0x298   :  { %v451_v19 = vand.u32 2147483647, %v450_v18  ;;  %v981_v18 = vld [vmem:[#allocation2 + $0x108] sm:$0xff] }
 0x29a   :  { %v454_v21 = vmul.f32 %v453_v20, %v451_v19 }
 0x29c   :  { %v455_v22 = vxor.u32 2147483648, %v454_v21 }
 0x29e   :  { %v456_v24 = vsel %vm373_vm11, %v455_v22, %v454_v21  ;;  %v980_v21 = vld [vmem:[#allocation2 + $0x100] sm:$0xff]  ;;  %v979_v22 = vld [vmem:[#allocation2 + $0xf8] sm:$0xff] }
 0x29f   :  { %v459_v25 = vsel %vm372_vm12, %v1645_v52, %v456_v24 }
 0x2a0   :  { %1509 = vcosq.f32 %v459_v25 }
 0x2a1   :  { %1511 = vsinq.f32 %v459_v25  ;;  %v978_v25 = vld [vmem:[#allocation2 + $0xf0] sm:$0xff] }
 0x2ad   :  { %v1510_v31 = vpop.eup %1509 }
 0x2ae   :  { %v1512_v32 = vpop.eup %1511  ;;  %v471_v33 = vxor.u32 2147483648, %v1510_v31 }
 0x2af   :  { %v468_v34 = vxor.u32 2147483648, %v1512_v32 }
 0x2b0   :  { %v472_v35 = vsel %vm470_vm13, %v471_v33, %v1512_v32 }
 0x2b1   :  { %v469_v36 = vsel %vm467_vm14, %v1510_v31, %v468_v34 }
 0x2b2   :  { %v473_v60 = vsel %vm466_vm15, %v469_v36, %v472_v35 }
 0x2b3   :  { %v474_v37 = vsel %vm463_vm3, nan, %v473_v60 }
 0x2b4   :  { %v475_v38 = vmul.f32 0.1, %v474_v37 }
 0x2b6   :  { %565 = vrot.lane.b32.xlu0 %v475_v38, %s1552_s24  ;;  %v1126_v38 = vrot.slane %v1633_v30, 4 }
 0x2e4   :  { %v561_v52 = vpop.permute.xlu1 %560 }
 0x2f5   :  { %v485_v39 = vpop.permute.xlu0 %484 }
 0x2f6   :  { %1407 = vmatmul.mubr.msk.f32.vlgmr.msra.gmra.mxu1 %vm34_vm1, %v485_v39 }
 0x2f7   :  { %1410 = vmatpush3.msra.mxu1 %v1660_v41  ;;  %1417 = vmatprep.mubr.msk.f32.mxu1 %vm1543_vm0, %v1542_v0 }
 0x2f8   :  { %1411 = vmatprep.subr.mxu1 %v1542_v0 }
 0x2f9   :  { %1412 = vmatpush3.msra.mxu1 %v1670_v50 }
 0x2fa   :  { %1413 = vmatprep.subr.mxu1 %v1542_v0 }
 0x2fb   :  { %1414 = vmatpush3.msra.mxu1 %v1674_v53 }
 0x2fc   :  { %1415 = vmatprep.subr.mxu1 %v1542_v0 }
 0x2fd   :  { %1416 = vmatpush3.msra.mxu1 %v1680_v55 }
 0x2fe   :  { %1418 = vmatmul.mubr.msk.f32.vlgmr.msra.gmra.mxu1 %vm580_vm4, %v1654_v17  ;;  %1420 = vmatprep.subr.mxu1 %v1542_v0 }
 0x2ff   :  { %1421 = vmatpush3.msra.mxu1 %v1660_v41  ;;  %1428 = vmatprep.mubr.msk.f32.mxu1 %vm1543_vm0, %v1542_v0 }
 0x300   :  { %1422 = vmatprep.subr.mxu1 %v1542_v0 }
 0x301   :  { %1423 = vmatpush3.msra.mxu1 %v1670_v50 }
 0x302   :  { %1424 = vmatprep.subr.mxu1 %v1542_v0 }
 0x303   :  { %1425 = vmatpush3.msra.mxu1 %v1674_v53 }
 0x304   :  { %1426 = vmatprep.subr.mxu1 %v1542_v0 }
 0x305   :  { %1427 = vmatpush3.msra.mxu1 %v1680_v55 }
 0x306   :  { %1429 = vmatmul.mubr.msk.f32.vlgmr.msra.gmra.mxu1 %vm580_vm4, %v561_v52  ;;  %1442 = vmatprep.subr.mxu1 %v1542_v0 }
 0x307   :  { %1443 = vmatpush3.msra.mxu1 %v1660_v41  ;;  %1450 = vmatprep.mubr.msk.f32.mxu1 %vm1543_vm0, %v1542_v0  ;;  %v891_v41 = vsel %vm112_vm2, %v1599_v5, 0.0  ;;  %v563_v5 = vadd.f32 %v1654_v17, %v561_v52 }
 0x308   :  { %1444 = vmatprep.subr.mxu1 %v1542_v0  ;;  %v892_v42 = vrot.slane %v891_v41, 4 }
 0x309   :  { %1445 = vmatpush3.msra.mxu1 %v1670_v50  ;;  %v899_v50 = vld [vmem:[#allocation2 + $0xe0] sm:$0xff] }
 0x30a   :  { %1446 = vmatprep.subr.mxu1 %v1542_v0  ;;  %v893_v43 = vadd.f32 %v892_v42, %v891_v41 }
 0x30b   :  { %1447 = vmatpush3.msra.mxu1 %v1674_v53 }
 0x30c   :  { %1448 = vmatprep.subr.mxu1 %v1542_v0  ;;  %v894_v44 = vrot.slane %v893_v43, 2 }
 0x30d   :  { %1449 = vmatpush3.msra.mxu1 %v1680_v55 }
 0x30e   :  { %1465 = vmatprep.subr.mxu1 %v1542_v0  ;;  %v895_v45 = vadd.f32 %v894_v44, %v893_v43 }
 0x310   :  { %v896_v46 = vrot.slane %v895_v45, 1 }
 0x312   :  { %v897_v47 = vadd.f32 %v896_v46, %v895_v45  ;;  %v1131_v46 = vrot.slane %v1633_v30, 5 }
 0x314   :  { %v898_v48 = vmul.f32 0.125, %v897_v47 }
 0x328   :  { %v566_v40 = vpop.permute.xlu0 %565 }
 0x329   :  { %1440 = vmatmul.mubr.msk.f32.vlgmr.msra.gmra.mxu0 %vm580_vm4, %v566_v40  ;;  %v568_v51 = vadd.f32 %v566_v40, %v563_v5 }
 0x32a   :  { %1457 = vmatprep.mubr.msk.f32.mxu0 %vm1543_vm0, %v1542_v0  ;;  %1454 = vmatpush3.msra.mxu0 %v900_v49 }
 0x32b   :  { %1455 = vmatprep.subr.mxu0 %v1542_v0  ;;  %v569_v53 = vmul.f32 0.33333334, %v568_v51 }
 0x32c   :  { %1456 = vmatpush3.msra.mxu0 %v899_v50 }
 0x32d   :  { %1458 = vmatmul.mubr.msk.f32.vlgmr.msra.gmra.mxu0 %vm112_vm2, %v898_v48  ;;  %1460 = vmatprep.subr.mxu0 %v1542_v0  ;;  %vm1218_vm2 = vcmask 64544  }
 0x32e   :  { %1462 = vmatprep.mubr.msk.f32.mxu0 %vm1543_vm0, %v1542_v0  ;;  %1461 = vmatpush3.msra.mxu0 %v982_v8 }
 0x32f   :  { %1476 = vmatprep.subr.mxu0 %v1542_v0 }
 0x331   :  { %1463 = vmatmul.mubr.msk.f32.vlgmr.msra.gmra.mxu0 %vm34_vm1, %v1594_v3 }
 0x332   :  { %1478 = vmatprep.mubr.msk.f32.mxu0 %vm1543_vm0, %v1542_v0  ;;  %1477 = vmatpush3.msra.mxu0 %v1130_v28 }
 0x3b6   :  { %v554_v54 = vpop.f32.mrf.mxu1 }
 0x3b7   :  { %v570_v55 = vmax.f32 %v554_v54, %v569_v53  ;;  %v873_v56 = vsel %vm872_vm5, %v554_v54, 0.0  ;;  %v558_v10 = vadd.f32 0.5, %v554_v54 }
 0x3b8   :  { %v1408_v57 = vpop.f32.mrf.mxu1  ;;  %v874_v1 = vrot.slane %v873_v56, 4 }
 0x3b9   :  { %572 = vrot.lane.b32.xlu1 %v570_v55, %s1551_s1 }
 0x3ba   :  { %v875_v2 = vadd.f32 %v874_v1, %v873_v56 }
 0x3bc   :  { %v876_v7 = vrot.slane %v875_v2, 2 }
 0x3be   :  { %v649_v58 = vpop.f32.mrf.mxu1  ;;  %v877_v9 = vadd.f32 %v876_v7, %v875_v2 }
 0x3bf   :  { %1213 = vst.msk [vmem:[%s1782_s3] sm:$0xff] %vm872_vm5, %v649_v58 }
 0x3c0   :  { %v1419_v59 = vpop.f32.mrf.mxu1  ;;  %v878_v13 = vrot.slane %v877_v9, 1 }
 0x3c2   :  { %v879_v14 = vadd.f32 %v878_v13, %v877_v9 }
 0x3c4   :  { %v881_v15 = vmul.f32 0.125, %v879_v14 }
 0x3c6   :  { %v721_v61 = vpop.f32.mrf.mxu1 }
 0x3c7   :  { %1215 = vrot.lane.b32.xlu1 %v721_v61, %s1553_s27 }
 0x3c8   :  { %v1430_v62 = vpop.f32.mrf.mxu1 }
 0x3e9   :  { %v793_v17 = vpop.f32.mrf.mxu0 }
 0x3eb   :  { %v1441_v63 = vpop.f32.mrf.mxu0 }
 0x3ed   :  { %v973_v4 = vpop.f32.mrf.mxu0 }
 0x3ee   :  { %v974_v20 = vadd.f32 %v973_v4, %v902_v16 }
 0x3ef   :  { %v1459_v6 = vpop.f32.mrf.mxu0 }
 0x3f0   :  { %v977_v24 = vmax.f32 %v974_v20, 0.0 }
 0x3f1   :  { %v1049_v26 = vpop.f32.mrf.mxu0 }
 0x3f3   :  { %v1464_v27 = vpop.f32.mrf.mxu0 }
 0x42b   :  { %v573_v11 = vpop.permute.xlu1 %572 }
 0x42c   :  { %v575_v12 = vmin.f32 %v558_v10, %v573_v11 }
 0x42e   :  { %798 = vrot.lane.b32.xlu0 %v575_v12, %s1550_s0 }
 0x432   :  { %1221 = vrot.lane.b32.xlu0 %v793_v17, %s1541_s16 }
 0x436   :  { %1233 = vrot.lane.b32.xlu0 %v881_v15, %s1554_s28 }
 0x439   :  { %v1216_v3 = vpop.permute.xlu1 %1215 }
 0x43a   :  { %1219 = vst.msk [vmem:[%s1782_s3] sm:$0xff] %vm1218_vm2, %v1216_v3 }
 0x4a0   :  { %v799_v19 = vpop.permute.xlu0 %798 }
 0x4a1   :  { %1451 = vmatmul.mubr.msk.f32.vlgmr.msra.gmra.mxu1 %vm580_vm4, %v799_v19 }
 0x4a2   :  { %1466 = vmatpush3.msra.mxu1 %v981_v18  ;;  %1473 = vmatprep.mubr.msk.f32.mxu1 %vm1543_vm0, %v1542_v0  ;;  %vm882_vm0 = vcmask 294144  }
 0x4a3   :  { %1467 = vmatprep.subr.mxu1 %v1542_v0  ;;  %v883_v29 = vsel %vm882_vm0, %v558_v10, 0.0 }
 0x4a4   :  { %1468 = vmatpush3.msra.mxu1 %v980_v21  ;;  %v1222_v23 = vpop.permute.xlu0 %1221  ;;  %v884_v31 = vrot.slane %v883_v29, 4 }
 0x4a5   :  { %1469 = vmatprep.subr.mxu1 %v1542_v0  ;;  %1225 = vst.msk [vmem:[%s1782_s3] sm:$0xff] %vm1224_vm6, %v1222_v23 }
 0x4a6   :  { %1470 = vmatpush3.msra.mxu1 %v979_v22  ;;  %v885_v32 = vadd.f32 %v884_v31, %v883_v29 }
 0x4a7   :  { %1471 = vmatprep.subr.mxu1 %v1542_v0 }
 0x4a8   :  { %1472 = vmatpush3.msra.mxu1 %v978_v25  ;;  %v886_v33 = vrot.slane %v885_v32, 2  ;;  %v1234_v44 = vpop.permute.xlu0 %1233 }
 0x4a9   :  { %1474 = vmatmul.mubr.msk.f32.vlgmr.msra.gmra.mxu1 %vm580_vm4, %v977_v24 }
 0x4aa   :  { %v887_v34 = vadd.f32 %v886_v33, %v885_v32 }
 0x4ac   :  { %v888_v35 = vrot.slane %v887_v34, 1 }
 0x4ae   :  { %v889_v36 = vadd.f32 %v888_v35, %v887_v34 }
 0x4b0   :  { %v890_v0 = vmul.f32 0.125, %v889_v36 }
 0x561   :  { %v868_v60 = vpop.f32.mrf.mxu1 }
 0x562   :  { %1227 = vrot.lane.b32.xlu1 %v868_v60, %s1541_s16 }
 0x563   :  { %v1452_v37 = vpop.f32.mrf.mxu1 }
 0x566   :  { %1239 = vrot.lane.b32.xlu1 %v890_v0, %s1555_s6 }
 0x569   :  { %v1122_v39 = vpop.f32.mrf.mxu1 }
 0x56a   :  { %v1123_v52 = vadd.f32 %v1122_v39, %v1049_v26 }
 0x56b   :  { %v1475_v40 = vpop.f32.mrf.mxu1 }
 0x56c   :  { %v1128_v41 = vadd.f32 %v1126_v38, %v1123_v52 }
 0x56e   :  { %v1129_v42 = vmax.f32 %v1128_v41, 0.0 }
 0x570   :  { %1479 = vmatmul.mubr.msk.f32.vlgmr.msra.gmra.mxu0 %vm34_vm1, %v1129_v42  ;;  %vm1248_vm1 = vcmask 196800  }
 0x5d4   :  { %v1228_v43 = vpop.permute.xlu1 %1227 }
 0x5d5   :  { %1231 = vst.msk [vmem:[%s1782_s3] sm:$0xff] %vm1230_vm7, %v1228_v43 }
 0x5d6   :  { %1237 = vst.msk [vmem:[%s1782_s3] sm:$0x1] %vm1236_vm8, %v1234_v44 }
 0x5d8   :  { %v1240_v45 = vpop.permute.xlu1 %1239 }
 0x5d9   :  { %1243 = vst.msk [vmem:[%s1782_s3] sm:$0x1] %vm1242_vm9, %v1240_v45 }
 0x630   :  { %v1202_v47 = vpop.f32.mrf.mxu0 }
 0x631   :  { %v1203_v48 = vadd.f32 %v1202_v47, %v1131_v46 }
 0x632   :  { %v1480_v49 = vpop.f32.mrf.mxu0 }
 0x633   :  { %v1272_v50 = vmul.f32 -1.442695, %v1203_v48 }
 0x635   :  { %1513 = vpow2.f32 %v1272_v50 }
 0x642   :  { %v1514_v5 = vpop.eup %1513 }
 0x643   :  { %v1209_v51 = vadd.f32 1.0, %v1514_v5 }
 0x645   :  { %1515 = vrcp.f32 %v1209_v51 }
 0x652   :  { %v1516_v53 = vpop.eup %1515 }
 0x653   :  { %1245 = vrot.lane.b32.xlu0 %v1516_v53, %s1556_s13 }
 0x6c5   :  { %v1246_v54 = vpop.permute.xlu0 %1245 }
 0x6c6   :  { %1249 = vst.msk [vmem:[%s1782_s3] sm:$0x1] %vm1248_vm1, %v1246_v54 }
 0x6c7   :  { %1254 = vsyncpa [#allocation3], 1 }

</bundles_post_ra>
